<compile_context>
chip_gen: v7x
topology: tpu7x:2x2x1
jax: 0.10.0
libtpu: 0.0.40
codegen_flags: <defaults>
</compile_context>

<pallas_src>
import functools

import jax
import jax.numpy as jnp
from jax.experimental import pallas as pl
from jax.experimental.pallas import tpu as pltpu

LANE = 128   # TPU lane width; all feature dims are padded to this.

_VMEM = pl.BlockSpec(memory_space=pltpu.MemorySpace.VMEM)


# ---------------------------------------------------------------------------
# Fused Pallas kernel: all GraphSage layers + folded post_mp + log_softmax
# ---------------------------------------------------------------------------

def _fused_gnn_kernel(x_ref, adj_ref, invdeg_ref,
                      wlin_ref, blin_ref, waggx_ref, wagga_ref, bagg_ref,
                      w12_ref, b12_ref,
                      o_ref, *, num_layers, out_dim):
    """x_ref: [Np, 128] bf16 padded features; adj_ref: [Np, Np] bf16 neighbor counts.

    invdeg_ref: [Np, 1] f32 reciprocal in-degree (0 for padded rows).
    wlin/waggx/wagga: [L, 128, 128] bf16; blin/bagg: [L, 1, 128] f32.
    w12: [128, 128] bf16 folded post_mp weight; b12: [1, 128] f32.
    o_ref: [Np, 128] f32 (lane-dense; wrapper slices to (N, out_dim)).
    """
    adj = adj_ref[...]                                   # [Np, Np] bf16, resident
    inv_deg = invdeg_ref[...]                            # [Np, 1] f32
    x_bf = x_ref[...]                                    # [Np, 128] bf16

    for l in range(num_layers):                          # static unroll (small L)
        # message(): relu(lin(x_j)) -- bf16 MXU matmul, f32 accumulate
        msg = jnp.dot(x_bf, wlin_ref[l], preferred_element_type=jnp.float32)
        msg = jnp.maximum(msg + blin_ref[l], 0.0)        # [Np, 128] f32

        # aggr = 'mean': sum over incoming edges via counts matmul, then exact
        # f32 multiply by reciprocal degree (no bf16-quantized 1/deg).
        aggr = jnp.dot(adj, msg.astype(jnp.bfloat16),
                       preferred_element_type=jnp.float32) * inv_deg

        # update(): concat matmul split into two accumulating dots (no scratch)
        h = (jnp.dot(x_bf, waggx_ref[l], preferred_element_type=jnp.float32)
             + jnp.dot(aggr.astype(jnp.bfloat16), wagga_ref[l],
                       preferred_element_type=jnp.float32)
             + bagg_ref[l])
        h = jnp.maximum(h, 0.0)                          # [Np, 128] f32

        # F.normalize(dim=-1), eps=1e-12  ->  h * rsqrt(max(sum(h^2), eps^2))
        sumsq = jnp.sum(h * h, axis=-1, keepdims=True)
        h = h * jax.lax.rsqrt(jnp.maximum(sumsq, 1e-24))

        # Outer relu is identity (h >= 0); dropout identity in eval mode.
        x_bf = h.astype(jnp.bfloat16)

    # folded post_mp: single Linear, then log_softmax(dim=1) in f32
    z = jnp.dot(x_bf, w12_ref[...], preferred_element_type=jnp.float32) + b12_ref[...]

    # mask padded output lanes so they contribute nothing to the logsumexp
    col = jax.lax.broadcasted_iota(jnp.int32, z.shape, 1)
    z = jnp.where(col < out_dim, z, jnp.float32(-1e30))
    m = jnp.max(z, axis=-1, keepdims=True)
    lse = jnp.log(jnp.sum(jnp.exp(z - m), axis=-1, keepdims=True)) + m
    o_ref[...] = z - lse


# ---------------------------------------------------------------------------
# Parameter init (PyTorch-Linear-style), padded to lane-dense MXU shapes
# ---------------------------------------------------------------------------

def _linear_params(key, fan_in, fan_out):
    """Deterministic PyTorch-Linear-style init; weight returned transposed [in, out]."""
    kw, kb = jax.random.split(key)
    bound = 1.0 / jnp.sqrt(float(fan_in))
    w_t = jax.random.uniform(kw, (fan_in, fan_out), jnp.float32, -bound, bound)
    b = jax.random.uniform(kb, (1, fan_out), jnp.float32, -bound, bound)
    return w_t, b


def init_gnnstack_params(key, input_dim, hidden_dim, output_dim, num_layers):
    assert max(input_dim, hidden_dim, output_dim) <= LANE, "dims must be <= 128"
    wlin_l, blin_l, waggx_l, wagga_l, bagg_l = [], [], [], [], []
    dims_in = [input_dim] + [hidden_dim] * (num_layers - 1)
    for c_in in dims_in:
        key, k1, k2 = jax.random.split(key, 3)
        wlin, blin = _linear_params(k1, c_in, hidden_dim)                # self.lin
        wagg, bagg = _linear_params(k2, c_in + hidden_dim, hidden_dim)   # self.agg_lin
        # zero-pad into lane-dense MXU tiles; zeros keep padded lanes inert.
        wlin_p = jnp.zeros((LANE, LANE), jnp.float32).at[:c_in, :hidden_dim].set(wlin)
        # Split concat weight into x-part and aggr-part (two accumulating dots).
        waggx_p = jnp.zeros((LANE, LANE), jnp.float32).at[:c_in, :hidden_dim].set(wagg[:c_in])
        wagga_p = jnp.zeros((LANE, LANE), jnp.float32).at[:hidden_dim, :hidden_dim].set(wagg[c_in:])
        wlin_l.append(wlin_p)
        waggx_l.append(waggx_p)
        wagga_l.append(wagga_p)
        blin_l.append(jnp.zeros((1, LANE), jnp.float32).at[:, :hidden_dim].set(blin))
        bagg_l.append(jnp.zeros((1, LANE), jnp.float32).at[:, :hidden_dim].set(bagg))

    key, k1, k2 = jax.random.split(key, 3)
    w1, b1 = _linear_params(k1, hidden_dim, hidden_dim)
    w2, b2 = _linear_params(k2, hidden_dim, output_dim)
    # Fold the two post_mp Linears (no nonlinearity between them, dropout=id in eval).
    w12 = w1 @ w2                       # [hidden, output] f32
    b12 = b1 @ w2 + b2                  # [1, output] f32

    return {
        "wlin": jnp.stack(wlin_l).astype(jnp.bfloat16),    # [L, 128, 128]
        "blin": jnp.stack(blin_l),                         # [L, 1, 128] f32
        "waggx": jnp.stack(waggx_l).astype(jnp.bfloat16),  # [L, 128, 128]
        "wagga": jnp.stack(wagga_l).astype(jnp.bfloat16),  # [L, 128, 128]
        "bagg": jnp.stack(bagg_l),                         # [L, 1, 128] f32
        "w12": jnp.zeros((LANE, LANE), jnp.float32)
                  .at[:hidden_dim, :output_dim].set(w12).astype(jnp.bfloat16),
        "b12": jnp.zeros((1, LANE), jnp.float32).at[:, :output_dim].set(b12),
    }


# ---------------------------------------------------------------------------
# Graph / input preprocessing (plain JAX glue)
# ---------------------------------------------------------------------------

def _round_up(v, m):
    return (v + m - 1) // m * m


def build_count_adjacency(edge_index, num_nodes, n_pad):
    """Dense neighbor-count adjacency (src->dst) in bf16 (exact small ints) and
    an f32 reciprocal in-degree column for exact mean aggregation."""
    src, dst = edge_index[0], edge_index[1]
    counts = jnp.zeros((num_nodes, num_nodes), jnp.float32).at[dst, src].add(1.0)
    deg = jnp.sum(counts, axis=1, keepdims=True)
    inv_deg = 1.0 / jnp.maximum(deg, 1.0)
    cnt_pad = jnp.zeros((n_pad, n_pad), jnp.float32).at[:num_nodes, :num_nodes].set(counts)
    inv_pad = jnp.zeros((n_pad, 1), jnp.float32).at[:num_nodes, :].set(inv_deg)
    return cnt_pad.astype(jnp.bfloat16), inv_pad


def pad_node_features(x, n_pad):
    n, f = x.shape
    x_pad = jnp.zeros((n_pad, LANE), jnp.float32).at[:n, :f].set(x)
    return x_pad.astype(jnp.bfloat16)


# ---------------------------------------------------------------------------
# Forward wrapper: ONE fused pallas_call for the whole network
# ---------------------------------------------------------------------------

@functools.partial(jax.jit, static_argnames=("num_layers", "num_nodes", "output_dim"))
def gnnstack_forward(params, x_pad, adj_pad, inv_deg, num_layers, num_nodes, output_dim):
    n_pad = x_pad.shape[0]
    kernel = functools.partial(_fused_gnn_kernel,
                               num_layers=num_layers, out_dim=output_dim)

    # Size scoped VMEM explicitly: resident adj + activations + weights + output,
    # ~2x headroom for f32 intermediates / compiler scratch, clamped to [32, 64] MiB.
    resident_bytes = (
        n_pad * n_pad * 2                       # adj (bf16 counts)
        + n_pad * LANE * 2                      # x (bf16)
        + n_pad * 4                             # inv_deg (f32)
        + n_pad * LANE * 4                      # output (f32)
        + num_layers * (3 * LANE * LANE * 2 + 2 * LANE * 4)   # per-layer weights/biases
        + LANE * LANE * 2 + LANE * 4            # folded post_mp
    )
    vmem_limit = min(64 * 1024 * 1024,
                     max(32 * 1024 * 1024, 2 * resident_bytes + (4 << 20)))

    out = pl.pallas_call(
        kernel,
        out_shape=jax.ShapeDtypeStruct((n_pad, LANE), jnp.float32),
        in_specs=[_VMEM] * 10,
        out_specs=_VMEM,
        compiler_params=pltpu.CompilerParams(vmem_limit_bytes=vmem_limit),
    )(x_pad, adj_pad, inv_deg,
      params["wlin"], params["blin"], params["waggx"], params["wagga"], params["bagg"],
      params["w12"], params["b12"])
    return out[:num_nodes, :output_dim]


# ---------------------------------------------------------------------------
# Main
# ---------------------------------------------------------------------------

if __name__ == "__main__":
    N = 16            # number of graph nodes
    E = 48            # number of directed edges
    INPUT_DIM = 8
    HIDDEN_DIM = 32
    OUTPUT_DIM = 4
    NUM_LAYERS = 2

    key = jax.random.PRNGKey(0)
    kx, ke, kp = jax.random.split(key, 3)

    # data.x : [N, input_dim];  data.edge_index : [2, E] int
    x = jax.random.normal(kx, (N, INPUT_DIM), jnp.float32)
    edge_index = jax.random.randint(ke, (2, E), 0, N, jnp.int32)

    params = init_gnnstack_params(kp, INPUT_DIM, HIDDEN_DIM, OUTPUT_DIM, NUM_LAYERS)

    n_pad = _round_up(N, 16)                      # bf16 sublane packing
    x_pad = pad_node_features(x, n_pad)
    adj_pad, inv_deg = build_count_adjacency(edge_index, N, n_pad)

    out = gnnstack_forward(params, x_pad, adj_pad, inv_deg,
                           NUM_LAYERS, N, OUTPUT_DIM)
    out = jax.block_until_ready(out)

    assert out.shape == (N, OUTPUT_DIM)
    # log_softmax rows should exponentiate-sum to ~1
    row_sums = jnp.sum(jnp.exp(out), axis=1)
    assert bool(jnp.all(jnp.abs(row_sums - 1.0) < 1e-4))

    print("KERNEL_OK")
</pallas_src>

<mosaic_0001>
module attributes {stable_mosaic.version = 11 : i64} {
  func.func @_fused_gnn_kernel(%arg0: memref<16x128xbf16, #tpu.memory_space<vmem>>, %arg1: memref<16x16xbf16, #tpu.memory_space<vmem>>, %arg2: memref<16x1xf32, #tpu.memory_space<vmem>>, %arg3: memref<2x128x128xbf16, #tpu.memory_space<vmem>>, %arg4: memref<2x1x128xf32, #tpu.memory_space<vmem>>, %arg5: memref<2x128x128xbf16, #tpu.memory_space<vmem>>, %arg6: memref<2x128x128xbf16, #tpu.memory_space<vmem>>, %arg7: memref<2x1x128xf32, #tpu.memory_space<vmem>>, %arg8: memref<128x128xbf16, #tpu.memory_space<vmem>>, %arg9: memref<1x128xf32, #tpu.memory_space<vmem>>, %arg10: memref<16x128xf32, #tpu.memory_space<vmem>>) attributes {dimension_semantics = [], scalar_prefetch = 0 : i64, scratch_operands = 0 : i64, tpu.core_type = #tpu.core_type<tc>} {
    %c0 = arith.constant 0 : index
    %c0_0 = arith.constant 0 : index
    %0 = vector.load %arg1[%c0, %c0_0] : memref<16x16xbf16, #tpu.memory_space<vmem>>, vector<16x16xbf16>
    %c0_1 = arith.constant 0 : index
    %c0_2 = arith.constant 0 : index
    %1 = vector.load %arg2[%c0_1, %c0_2] : memref<16x1xf32, #tpu.memory_space<vmem>>, vector<16x1xf32>
    %c0_3 = arith.constant 0 : index
    %c0_4 = arith.constant 0 : index
    %2 = vector.load %arg0[%c0_3, %c0_4] : memref<16x128xbf16, #tpu.memory_space<vmem>>, vector<16x128xbf16>
    %c0_5 = arith.constant 0 : index
    %c0_6 = arith.constant 0 : index
    %c0_7 = arith.constant 0 : index
    %3 = vector.load %arg3[%c0_5, %c0_6, %c0_7] : memref<2x128x128xbf16, #tpu.memory_space<vmem>>, vector<1x128x128xbf16>
    %4 = vector.shape_cast %3 : vector<1x128x128xbf16> to vector<128x128xbf16>
    %cst = arith.constant dense<0.000000e+00> : vector<16x128xf32>
    %5 = tpu.matmul %2, %4, %cst {dimension_numbers = #tpu.dot_dimension_numbers<[1], [0], [0], [1], [0, 0, 1, 1], [], []>} : vector<16x128xbf16>, vector<128x128xbf16>, vector<16x128xf32> -> vector<16x128xf32>
    %c0_8 = arith.constant 0 : index
    %c0_9 = arith.constant 0 : index
    %c0_10 = arith.constant 0 : index
    %6 = vector.load %arg4[%c0_8, %c0_9, %c0_10] : memref<2x1x128xf32, #tpu.memory_space<vmem>>, vector<1x1x128xf32>
    %7 = vector.shape_cast %6 : vector<1x1x128xf32> to vector<1x128xf32>
    %8 = vector.broadcast %7 : vector<1x128xf32> to vector<16x128xf32>
    %9 = arith.addf %5, %8 : vector<16x128xf32>
    %cst_11 = arith.constant 0.000000e+00 : f32
    %10 = vector.broadcast %cst_11 : f32 to vector<16x128xf32>
    %11 = arith.maximumf %9, %10 : vector<16x128xf32>
    %12 = arith.truncf %11 : vector<16x128xf32> to vector<16x128xbf16>
    %cst_12 = arith.constant dense<0.000000e+00> : vector<16x128xf32>
    %13 = tpu.matmul %0, %12, %cst_12 {dimension_numbers = #tpu.dot_dimension_numbers<[1], [0], [0], [1], [0, 0, 1, 1], [], []>} : vector<16x16xbf16>, vector<16x128xbf16>, vector<16x128xf32> -> vector<16x128xf32>
    %14 = vector.broadcast %1 : vector<16x1xf32> to vector<16x128xf32>
    %15 = arith.mulf %13, %14 : vector<16x128xf32>
    %c0_13 = arith.constant 0 : index
    %c0_14 = arith.constant 0 : index
    %c0_15 = arith.constant 0 : index
    %16 = vector.load %arg5[%c0_13, %c0_14, %c0_15] : memref<2x128x128xbf16, #tpu.memory_space<vmem>>, vector<1x128x128xbf16>
    %17 = vector.shape_cast %16 : vector<1x128x128xbf16> to vector<128x128xbf16>
    %cst_16 = arith.constant dense<0.000000e+00> : vector<16x128xf32>
    %18 = tpu.matmul %2, %17, %cst_16 {dimension_numbers = #tpu.dot_dimension_numbers<[1], [0], [0], [1], [0, 0, 1, 1], [], []>} : vector<16x128xbf16>, vector<128x128xbf16>, vector<16x128xf32> -> vector<16x128xf32>
    %19 = arith.truncf %15 : vector<16x128xf32> to vector<16x128xbf16>
    %c0_17 = arith.constant 0 : index
    %c0_18 = arith.constant 0 : index
    %c0_19 = arith.constant 0 : index
    %20 = vector.load %arg6[%c0_17, %c0_18, %c0_19] : memref<2x128x128xbf16, #tpu.memory_space<vmem>>, vector<1x128x128xbf16>
    %21 = vector.shape_cast %20 : vector<1x128x128xbf16> to vector<128x128xbf16>
    %cst_20 = arith.constant dense<0.000000e+00> : vector<16x128xf32>
    %22 = tpu.matmul %19, %21, %cst_20 {dimension_numbers = #tpu.dot_dimension_numbers<[1], [0], [0], [1], [0, 0, 1, 1], [], []>} : vector<16x128xbf16>, vector<128x128xbf16>, vector<16x128xf32> -> vector<16x128xf32>
    %23 = arith.addf %18, %22 : vector<16x128xf32>
    %c0_21 = arith.constant 0 : index
    %c0_22 = arith.constant 0 : index
    %c0_23 = arith.constant 0 : index
    %24 = vector.load %arg7[%c0_21, %c0_22, %c0_23] : memref<2x1x128xf32, #tpu.memory_space<vmem>>, vector<1x1x128xf32>
    %25 = vector.shape_cast %24 : vector<1x1x128xf32> to vector<1x128xf32>
    %26 = vector.broadcast %25 : vector<1x128xf32> to vector<16x128xf32>
    %27 = arith.addf %23, %26 : vector<16x128xf32>
    %cst_24 = arith.constant 0.000000e+00 : f32
    %28 = vector.broadcast %cst_24 : f32 to vector<16x128xf32>
    %29 = arith.maximumf %27, %28 : vector<16x128xf32>
    %30 = arith.mulf %29, %29 : vector<16x128xf32>
    %cst_25 = arith.constant dense<0.000000e+00> : vector<16xf32>
    %31 = vector.multi_reduction <add>, %30, %cst_25 [1] : vector<16x128xf32> to vector<16xf32>
    %32 = vector.shape_cast %31 : vector<16xf32> to vector<16x1xf32>
    %cst_26 = arith.constant 1.000000e-24 : f32
    %33 = vector.broadcast %cst_26 : f32 to vector<16x1xf32>
    %34 = arith.maximumf %32, %33 : vector<16x1xf32>
    %35 = math.rsqrt %34 : vector<16x1xf32>
    %36 = vector.broadcast %35 : vector<16x1xf32> to vector<16x128xf32>
    %37 = arith.mulf %29, %36 : vector<16x128xf32>
    %38 = arith.truncf %37 : vector<16x128xf32> to vector<16x128xbf16>
    %c1 = arith.constant 1 : index
    %c0_27 = arith.constant 0 : index
    %c0_28 = arith.constant 0 : index
    %39 = vector.load %arg3[%c1, %c0_27, %c0_28] : memref<2x128x128xbf16, #tpu.memory_space<vmem>>, vector<1x128x128xbf16>
    %40 = vector.shape_cast %39 : vector<1x128x128xbf16> to vector<128x128xbf16>
    %cst_29 = arith.constant dense<0.000000e+00> : vector<16x128xf32>
    %41 = tpu.matmul %38, %40, %cst_29 {dimension_numbers = #tpu.dot_dimension_numbers<[1], [0], [0], [1], [0, 0, 1, 1], [], []>} : vector<16x128xbf16>, vector<128x128xbf16>, vector<16x128xf32> -> vector<16x128xf32>
    %c1_30 = arith.constant 1 : index
    %c0_31 = arith.constant 0 : index
    %c0_32 = arith.constant 0 : index
    %42 = vector.load %arg4[%c1_30, %c0_31, %c0_32] : memref<2x1x128xf32, #tpu.memory_space<vmem>>, vector<1x1x128xf32>
    %43 = vector.shape_cast %42 : vector<1x1x128xf32> to vector<1x128xf32>
    %44 = vector.broadcast %43 : vector<1x128xf32> to vector<16x128xf32>
    %45 = arith.addf %41, %44 : vector<16x128xf32>
    %cst_33 = arith.constant 0.000000e+00 : f32
    %46 = vector.broadcast %cst_33 : f32 to vector<16x128xf32>
    %47 = arith.maximumf %45, %46 : vector<16x128xf32>
    %48 = arith.truncf %47 : vector<16x128xf32> to vector<16x128xbf16>
    %cst_34 = arith.constant dense<0.000000e+00> : vector<16x128xf32>
    %49 = tpu.matmul %0, %48, %cst_34 {dimension_numbers = #tpu.dot_dimension_numbers<[1], [0], [0], [1], [0, 0, 1, 1], [], []>} : vector<16x16xbf16>, vector<16x128xbf16>, vector<16x128xf32> -> vector<16x128xf32>
    %50 = vector.broadcast %1 : vector<16x1xf32> to vector<16x128xf32>
    %51 = arith.mulf %49, %50 : vector<16x128xf32>
    %c1_35 = arith.constant 1 : index
    %c0_36 = arith.constant 0 : index
    %c0_37 = arith.constant 0 : index
    %52 = vector.load %arg5[%c1_35, %c0_36, %c0_37] : memref<2x128x128xbf16, #tpu.memory_space<vmem>>, vector<1x128x128xbf16>
    %53 = vector.shape_cast %52 : vector<1x128x128xbf16> to vector<128x128xbf16>
    %cst_38 = arith.constant dense<0.000000e+00> : vector<16x128xf32>
    %54 = tpu.matmul %38, %53, %cst_38 {dimension_numbers = #tpu.dot_dimension_numbers<[1], [0], [0], [1], [0, 0, 1, 1], [], []>} : vector<16x128xbf16>, vector<128x128xbf16>, vector<16x128xf32> -> vector<16x128xf32>
    %55 = arith.truncf %51 : vector<16x128xf32> to vector<16x128xbf16>
    %c1_39 = arith.constant 1 : index
    %c0_40 = arith.constant 0 : index
    %c0_41 = arith.constant 0 : index
    %56 = vector.load %arg6[%c1_39, %c0_40, %c0_41] : memref<2x128x128xbf16, #tpu.memory_space<vmem>>, vector<1x128x128xbf16>
    %57 = vector.shape_cast %56 : vector<1x128x128xbf16> to vector<128x128xbf16>
    %cst_42 = arith.constant dense<0.000000e+00> : vector<16x128xf32>
    %58 = tpu.matmul %55, %57, %cst_42 {dimension_numbers = #tpu.dot_dimension_numbers<[1], [0], [0], [1], [0, 0, 1, 1], [], []>} : vector<16x128xbf16>, vector<128x128xbf16>, vector<16x128xf32> -> vector<16x128xf32>
    %59 = arith.addf %54, %58 : vector<16x128xf32>
    %c1_43 = arith.constant 1 : index
    %c0_44 = arith.constant 0 : index
    %c0_45 = arith.constant 0 : index
    %60 = vector.load %arg7[%c1_43, %c0_44, %c0_45] : memref<2x1x128xf32, #tpu.memory_space<vmem>>, vector<1x1x128xf32>
    %61 = vector.shape_cast %60 : vector<1x1x128xf32> to vector<1x128xf32>
    %62 = vector.broadcast %61 : vector<1x128xf32> to vector<16x128xf32>
    %63 = arith.addf %59, %62 : vector<16x128xf32>
    %cst_46 = arith.constant 0.000000e+00 : f32
    %64 = vector.broadcast %cst_46 : f32 to vector<16x128xf32>
    %65 = arith.maximumf %63, %64 : vector<16x128xf32>
    %66 = arith.mulf %65, %65 : vector<16x128xf32>
    %cst_47 = arith.constant dense<0.000000e+00> : vector<16xf32>
    %67 = vector.multi_reduction <add>, %66, %cst_47 [1] : vector<16x128xf32> to vector<16xf32>
    %68 = vector.shape_cast %67 : vector<16xf32> to vector<16x1xf32>
    %cst_48 = arith.constant 1.000000e-24 : f32
    %69 = vector.broadcast %cst_48 : f32 to vector<16x1xf32>
    %70 = arith.maximumf %68, %69 : vector<16x1xf32>
    %71 = math.rsqrt %70 : vector<16x1xf32>
    %72 = vector.broadcast %71 : vector<16x1xf32> to vector<16x128xf32>
    %73 = arith.mulf %65, %72 : vector<16x128xf32>
    %74 = arith.truncf %73 : vector<16x128xf32> to vector<16x128xbf16>
    %c0_49 = arith.constant 0 : index
    %c0_50 = arith.constant 0 : index
    %75 = vector.load %arg8[%c0_49, %c0_50] : memref<128x128xbf16, #tpu.memory_space<vmem>>, vector<128x128xbf16>
    %cst_51 = arith.constant dense<0.000000e+00> : vector<16x128xf32>
    %76 = tpu.matmul %74, %75, %cst_51 {dimension_numbers = #tpu.dot_dimension_numbers<[1], [0], [0], [1], [0, 0, 1, 1], [], []>} : vector<16x128xbf16>, vector<128x128xbf16>, vector<16x128xf32> -> vector<16x128xf32>
    %c0_52 = arith.constant 0 : index
    %c0_53 = arith.constant 0 : index
    %77 = vector.load %arg9[%c0_52, %c0_53] : memref<1x128xf32, #tpu.memory_space<vmem>>, vector<1x128xf32>
    %78 = vector.broadcast %77 : vector<1x128xf32> to vector<16x128xf32>
    %79 = arith.addf %76, %78 : vector<16x128xf32>
    %80 = tpu.iota {dimensions = array<i32: 1>} : vector<16x128xi32>
    %c4_i32 = arith.constant 4 : i32
    %81 = vector.broadcast %c4_i32 : i32 to vector<16x128xi32>
    %82 = arith.cmpi slt, %80, %81 : vector<16x128xi32>
    %cst_54 = arith.constant -1.000000e+30 : f32
    %83 = vector.broadcast %cst_54 : f32 to vector<16x128xf32>
    %84 = arith.select %82, %79, %83 : vector<16x128xi1>, vector<16x128xf32>
    %cst_55 = arith.constant dense<0xFF800000> : vector<16xf32>
    %85 = vector.multi_reduction <maximumf>, %84, %cst_55 [1] : vector<16x128xf32> to vector<16xf32>
    %86 = vector.shape_cast %85 : vector<16xf32> to vector<16x1xf32>
    %87 = vector.broadcast %86 : vector<16x1xf32> to vector<16x128xf32>
    %88 = arith.subf %84, %87 : vector<16x128xf32>
    %89 = math.exp %88 : vector<16x128xf32>
    %cst_56 = arith.constant dense<0.000000e+00> : vector<16xf32>
    %90 = vector.multi_reduction <add>, %89, %cst_56 [1] : vector<16x128xf32> to vector<16xf32>
    %91 = vector.shape_cast %90 : vector<16xf32> to vector<16x1xf32>
    %92 = math.log %91 : vector<16x1xf32>
    %93 = arith.addf %92, %86 : vector<16x1xf32>
    %94 = vector.broadcast %93 : vector<16x1xf32> to vector<16x128xf32>
    %95 = arith.subf %84, %94 : vector<16x128xf32>
    %c0_57 = arith.constant 0 : index
    %c0_58 = arith.constant 0 : index
    %96 = vector.load %arg10[%c0_57, %c0_58] : memref<16x128xf32, #tpu.memory_space<vmem>>, vector<16x128xf32>
    tpu.vector_store %arg10[%c0_57, %c0_58], %95 {strides = array<i32>} : memref<16x128xf32, #tpu.memory_space<vmem>>, vector<16x128xf32>,
    return
  }
}

</mosaic_0001>

<bundles_post_ra>
// kernel: gnnstack_forward.1
= control target key start
LH: loop header
LB: loop body
LE: loop exit
PB: predicated region body
PF: predicated region fallthrough
CT: control target
= control target key end

     0   :  { %15 = vsyncpa [#allocation3], 0  ;;  %s1834_s0 = inlined_call_operand.vmem [shape: bf16[16,128], index: 0, kind: input, shape index: {}]   ;;  %s1835_s1 = inlined_call_operand.vmem [shape: bf16[16,16], index: 1, kind: input, shape index: {}]   ;;  %s1836_s2 = inlined_call_operand.vmem [shape: f32[16,1], index: 2, kind: input, shape index: {}]   ;;  %s1837_s3 = inlined_call_operand.hbm [shape: bf16[2,128,128], index: 3, kind: input, shape index: {}]   ;;  %s1838_s4 = inlined_call_operand.vmem [shape: f32[2,1,128], index: 4, kind: input, shape index: {}]   ;;  %s1839_s5 = inlined_call_operand.hbm [shape: bf16[2,128,128], index: 5, kind: input, shape index: {}]   ;;  %s1840_s6 = inlined_call_operand.hbm [shape: bf16[2,128,128], index: 6, kind: input, shape index: {}]   ;;  %s1841_s7 = inlined_call_operand.vmem [shape: f32[2,1,128], index: 7, kind: input, shape index: {}]   ;;  %s1842_s8 = inlined_call_operand.hbm [shape: bf16[128,128], index: 8, kind: input, shape index: {}]   ;;  %s1843_s9 = inlined_call_operand.hbm [shape: f32[1,128], index: 9, kind: input, shape index: {}]   ;;  %s1844_s10 = inlined_call_operand.vmem [shape: f32[16,128], index: 10, kind: output, shape index: {}]  }
   0x1   :  { %16 = vsyncpa [#allocation5], 0 }
   0x2   :  { %17 = vsyncpa [#allocation8], 0  ;;  %s1559_s13 = smov [#allocation4]   ;;  %s1560_s15 = smov [#allocation7]  }
   0x3   :  { %s43_s14 = sshll.u32 %s1559_s13, 4  ;;  %s69_s16 = sshll.u32 %s1560_s15, 4  ;;  %s44_s14 = int_to_ptr.vmem [resolvable:$true] %s43_s14  ;;  %s1624_s16 = int_to_ptr.vmem [resolvable:$true] %s69_s16 }
   0x4   :  { %s1443_s19 = scalar_lea.hbm %s1839_s5, 2048 }
   0x5   :  { %p1444_p0 = scmp.ne.s32.totalorder %s1839_s5, %s1443_s19  ;;  %p1447_p1 = scmp.lt.u32.totalorder %s1443_s19, %s1839_s5 }
   0x7   :  { %p1449_p2 = pnand %p1447_p1, %p1444_p0 }
   0x9   :  { %1452 = shalt.err (!%p1449_p2)
}
   0xa   :  { %s1453_s24 = scalar_lea.vmem %s44_s14, 2048  ;;  %p1458_p4 = scmp.lt.s32.totalorder %s44_s14, %s44_s14 }
   0xb   :  { %p1454_p3 = scmp.ne.s32.totalorder %s44_s14, %s1453_s24  ;;  %p1459_p5 = scmp.lt.s32.totalorder %s1453_s24, %s1453_s24 }
   0xd   :  { %p1460_p6 = por %p1459_p5, %p1458_p4 }
   0xf   :  { %p1461_p7 = pnand %p1460_p6, %p1454_p3 }
  0x11   :  { %1464 = shalt.err (!%p1461_p7)
}
  0x12   :  { %s1561_s25 = smov 64   ;;  %s1562_s26 = smov 4  }
  0x13   :  { %49 = dma.hbm_to_vmem [thread:$0]  %s1839_s5, 2048, %s44_s14, [#allocation5], %s1561_s25, %s1561_s25, %s1562_s26  }
  0x14   :  { %s1465_s11 = scalar_lea.hbm %s1842_s8, 1024 }
  0x15   :  { %p1466_p8 = scmp.ne.s32.totalorder %s1842_s8, %s1465_s11  ;;  %p1469_p9 = scmp.lt.u32.totalorder %s1465_s11, %s1842_s8 }
  0x17   :  { %p1471_p10 = pnand %p1469_p9, %p1466_p8 }
  0x19   :  { %1474 = shalt.err (!%p1471_p10)
}
  0x1a   :  { %s1475_s18 = scalar_lea.vmem %s1624_s16, 1024  ;;  %p1480_p12 = scmp.lt.s32.totalorder %s1624_s16, %s1624_s16 }
  0x1b   :  { %p1476_p11 = scmp.ne.s32.totalorder %s1624_s16, %s1475_s18  ;;  %p1481_p13 = scmp.lt.s32.totalorder %s1475_s18, %s1475_s18 }
  0x1d   :  { %p1482_p0 = por %p1481_p13, %p1480_p12 }
  0x1f   :  { %p1483_p1 = pnand %p1482_p0, %p1476_p11 }
  0x21   :  { %1486 = shalt.err (!%p1483_p1)
}
  0x22   :  { %75 = dma.hbm_to_vmem [thread:$0]  %s1842_s8, 1024, %s1624_s16, [#allocation8], %s1561_s25, %s1561_s25, %s1562_s26  }
  0x23   :  { %s1563_s19 = smov [#allocation2]   ;;  %s1564_s21 = smov [#allocation6]  }
  0x24   :  { %s29_s20 = sshll.u32 %s1563_s19, 4  ;;  %s55_s22 = sshll.u32 %s1564_s21, 4  ;;  %s30_s20 = int_to_ptr.vmem [resolvable:$true] %s29_s20  ;;  %s1661_s22 = int_to_ptr.vmem [resolvable:$true] %s55_s22 }
  0x25   :  { %s1487_s27 = scalar_lea.hbm %s1837_s3, 2048 }
  0x26   :  { %p1488_p2 = scmp.ne.s32.totalorder %s1837_s3, %s1487_s27  ;;  %p1491_p3 = scmp.lt.u32.totalorder %s1487_s27, %s1837_s3 }
  0x28   :  { %p1493_p4 = pnand %p1491_p3, %p1488_p2 }
  0x2a   :  { %1496 = shalt.err (!%p1493_p4)
}
  0x2b   :  { %s1497_s8 = scalar_lea.vmem %s30_s20, 2048  ;;  %p1502_p6 = scmp.lt.s32.totalorder %s30_s20, %s30_s20 }
  0x2c   :  { %p1498_p5 = scmp.ne.s32.totalorder %s30_s20, %s1497_s8  ;;  %p1503_p7 = scmp.lt.s32.totalorder %s1497_s8, %s1497_s8 }
  0x2e   :  { %p1504_p8 = por %p1503_p7, %p1502_p6 }
  0x30   :  { %p1505_p9 = pnand %p1504_p8, %p1498_p5 }
  0x32   :  { %1508 = shalt.err (!%p1505_p9)
}
  0x33   :  { %35 = dma.hbm_to_vmem [thread:$0]  %s1837_s3, 2048, %s30_s20, [#allocation3], %s1561_s25, %s1561_s25, %s1562_s26  }
  0x34   :  { %s1509_s17 = scalar_lea.hbm %s1840_s6, 2048 }
  0x35   :  { %p1510_p10 = scmp.ne.s32.totalorder %s1840_s6, %s1509_s17  ;;  %p1513_p11 = scmp.lt.u32.totalorder %s1509_s17, %s1840_s6 }
  0x37   :  { %p1515_p12 = pnand %p1513_p11, %p1510_p10 }
  0x39   :  { %1518 = shalt.err (!%p1515_p12)
}
  0x3a   :  { %s1519_s21 = scalar_lea.vmem %s1661_s22, 2048  ;;  %p1524_p0 = scmp.lt.s32.totalorder %s1661_s22, %s1661_s22 }
  0x3b   :  { %p1520_p13 = scmp.ne.s32.totalorder %s1661_s22, %s1519_s21  ;;  %p1525_p1 = scmp.lt.s32.totalorder %s1519_s21, %s1519_s21 }
  0x3d   :  { %p1526_p2 = por %p1525_p1, %p1524_p0 }
  0x3f   :  { %p1527_p3 = pnand %p1526_p2, %p1520_p13 }
  0x41   :  { %1530 = shalt.err (!%p1527_p3)
}
  0x42   :  { %61 = dma.hbm_to_vmem [thread:$0]  %s1840_s6, 2048, %s1661_s22, [#allocation5], %s1561_s25, %s1561_s25, %s1562_s26  }
  0x43   :  { %s1565_s23 = smov [#allocation9]   ;;  %s1531_s29 = scalar_lea.hbm %s1843_s9, 16 }
  0x44   :  { %s82_s24 = sshll.u32 %s1565_s23, 4  ;;  %p1532_p4 = scmp.ne.s32.totalorder %s1843_s9, %s1531_s29  ;;  %s83_s24 = int_to_ptr.vmem [resolvable:$true] %s82_s24 }
  0x45   :  { %p1535_p5 = scmp.lt.u32.totalorder %s1531_s29, %s1843_s9 }
  0x47   :  { %p1537_p6 = pnand %p1535_p5, %p1532_p4 }
  0x49   :  { %1540 = shalt.err (!%p1537_p6)
}
  0x4a   :  { %s1541_s12 = scalar_lea.vmem %s83_s24, 16  ;;  %s1545_s6 = scalar_lea.vmem %s83_s24, 32 }
  0x4b   :  { %p1542_p7 = scmp.ne.s32.totalorder %s83_s24, %s1541_s12  ;;  %p1546_p8 = scmp.lt.s32.totalorder %s83_s24, %s83_s24 }
  0x4c   :  { %p1547_p9 = scmp.lt.s32.totalorder %s1545_s6, %s1541_s12 }
  0x4e   :  { %p1548_p10 = por %p1547_p9, %p1546_p8 }
  0x50   :  { %p1549_p11 = pnand %p1548_p10, %p1542_p7 }
  0x52   :  { %1552 = shalt.err (!%p1549_p11)
}
  0x53   :  { %85 = dma.hbm_to_vmem [thread:$0]  %s1843_s9, 16, %s83_s24, [#allocation8]  }
  0x54   :  { %1553 = dma.done.wait [#allocation3], 2048  }
  0x55   :  { %1554 = vsyncadd [#allocation3], 4294965248 }
  0x56   :  { %1555 = dma.done.wait [#allocation5], 4096  }
  0x57   :  { %1556 = vsyncadd [#allocation5], 4294963200 }
  0x58   :  { %1557 = dma.done.wait [#allocation8], 1040  }
  0x59   :  { %1558 = vsyncadd [#allocation8], 4294966256  ;;  %v1566_v0 = vmov 0.0   ;;  %vm1567_vm0 = vmmov 0   ;;  %v1369_v1 = vld [vmem:[#allocation2] sm:$0xff]   ;;  %v1370_v2 = vld [vmem:[#allocation2 + $0x8] sm:$0xff]  }
  0x5a   :  { %1206 = vmatprep.subr.bf16.mxu0 %v1566_v0  ;;  %1222 = vmatprep.mubr.msk.bf16.mxu0 %vm1567_vm0, %v1566_v0  ;;  %v1371_v3 = vld [vmem:[#allocation2 + $0x10] sm:$0xff]   ;;  %v1372_v4 = vld [vmem:[#allocation2 + $0x18] sm:$0xff]   ;;  %v1373_v5 = vld [vmem:[#allocation2 + $0x20] sm:$0xff]   ;;  %v1568_v11 = vmov 0   ;;  %vm234_vm1 = vcmask 130048  }
  0x5b   :  { %1232 = vmatprep.subr.bf16.mxu1 %v1566_v0  ;;  %1248 = vmatprep.mubr.msk.bf16.mxu1 %vm1567_vm0, %v1566_v0  ;;  %v1374_v6 = vld [vmem:[#allocation2 + $0x28] sm:$0xff]   ;;  %v1375_v7 = vld [vmem:[#allocation2 + $0x30] sm:$0xff]   ;;  %v1376_v8 = vld [vmem:[#allocation2 + $0x38] sm:$0xff]  }
  0x5c   :  { %1207 = vmatpush3.bf16.msra.mxu0 %v1369_v1  ;;  %v1726_v9 = vld [vmem:[%s1834_s0] sm:$0xff]   ;;  %1368 = vset.pattern.permute.xlu0 %v1568_v11  ;;  %v105_v13 = vld [vmem:[%s1836_s2 + $0x8] sm:$0xff]  ;;  %v1384_v15 = vld [vmem:[#allocation6 + $0x10] sm:$0xff]  }
  0x5d   :  { %1208 = vmatprep.subr.bf16.mxu0 %v1566_v0  ;;  %v104_v10 = vld [vmem:[%s1836_s2] sm:$0xff]  ;;  %v1382_v14 = vld [vmem:[#allocation6 + $0x8] sm:$0xff]   ;;  %v1386_v16 = vld [vmem:[#allocation6 + $0x18] sm:$0xff]  }
  0x5e   :  { %v1380_v12 = vld [vmem:[#allocation6] sm:$0xff]   ;;  %281 = vperm.xlu0 %1368, %v104_v10   ;;  %v1390_v18 = vld [vmem:[#allocation6 + $0x28] sm:$0xff]   ;;  %v1383_v32 = vld [vmem:[#allocation4 + $0x10] sm:$0xff]  }
  0x5f   :  { %1233 = vmatpush3.bf16.msra.mxu1 %v1380_v12  ;;  %v1388_v17 = vld [vmem:[#allocation6 + $0x20] sm:$0xff]   ;;  %v1381_v31 = vld [vmem:[#allocation4 + $0x8] sm:$0xff]   ;;  %v1385_v33 = vld [vmem:[#allocation4 + $0x18] sm:$0xff]  }
  0x60   :  { %1209 = vmatpush3.bf16.msra.mxu0 %v1370_v2  ;;  %1234 = vmatprep.subr.bf16.mxu1 %v1566_v0  ;;  %v1072_v19 = vld [vmem:[%s1838_s4] ss:$0 sm:$0xff]  ;;  %v1389_v35 = vld [vmem:[#allocation4 + $0x28] sm:$0xff]   ;;  %v1391_v36 = vld [vmem:[#allocation4 + $0x30] sm:$0xff]  }
  0x61   :  { %1210 = vmatprep.subr.bf16.mxu0 %v1566_v0  ;;  %v1750_v29 = vld [vmem:[%s1835_s1] sm:$0xff]   ;;  %v1392_v37 = vld [vmem:[#allocation6 + $0x30] sm:$0xff]   ;;  %v1393_v38 = vld [vmem:[#allocation4 + $0x38] sm:$0xff]  }
  0x62   :  { %286 = vperm.xlu0 %1368, %v105_v13   ;;  %v1379_v30 = vld [vmem:[#allocation4] sm:$0xff]   ;;  %v1394_v39 = vld [vmem:[#allocation6 + $0x38] sm:$0xff]   ;;  %v1396_v54 = vld [vmem:[#allocation2 + $0x48] sm:$0xff]  }
  0x63   :  { %1235 = vmatpush3.bf16.msra.mxu1 %v1382_v14  ;;  %v1387_v34 = vld [vmem:[#allocation4 + $0x20] sm:$0xff]   ;;  %v1397_v55 = vld [vmem:[#allocation2 + $0x50] sm:$0xff]   ;;  %v1402_v10 = vld [vmem:[#allocation2 + $0x78] sm:$0xff]  }
  0x64   :  { %1211 = vmatpush3.bf16.msra.mxu0 %v1371_v3  ;;  %1236 = vmatprep.subr.bf16.mxu1 %v1566_v0  ;;  %v1395_v53 = vld [vmem:[#allocation2 + $0x40] sm:$0xff]  }
  0x65   :  { %1212 = vmatprep.subr.bf16.mxu0 %v1566_v0  ;;  %v1100_v57 = vld [vmem:[%s1841_s7] ss:$0 sm:$0xff] }
  0x67   :  { %1237 = vmatpush3.bf16.msra.mxu1 %v1384_v15 }
  0x68   :  { %1213 = vmatpush3.bf16.msra.mxu0 %v1372_v4  ;;  %1238 = vmatprep.subr.bf16.mxu1 %v1566_v0 }
  0x69   :  { %1214 = vmatprep.subr.bf16.mxu0 %v1566_v0 }
  0x6b   :  { %1239 = vmatpush3.bf16.msra.mxu1 %v1386_v16 }
  0x6c   :  { %1215 = vmatpush3.bf16.msra.mxu0 %v1373_v5  ;;  %1240 = vmatprep.subr.bf16.mxu1 %v1566_v0 }
  0x6d   :  { %1216 = vmatprep.subr.bf16.mxu0 %v1566_v0 }
  0x6f   :  { %1241 = vmatpush3.bf16.msra.mxu1 %v1388_v17 }
  0x70   :  { %1217 = vmatpush3.bf16.msra.mxu0 %v1374_v6  ;;  %1242 = vmatprep.subr.bf16.mxu1 %v1566_v0  ;;  %v1398_v6 = vld [vmem:[#allocation2 + $0x58] sm:$0xff]  }
  0x71   :  { %1218 = vmatprep.subr.bf16.mxu0 %v1566_v0 }
  0x73   :  { %1243 = vmatpush3.bf16.msra.mxu1 %v1390_v18 }
  0x74   :  { %1219 = vmatpush3.bf16.msra.mxu0 %v1375_v7  ;;  %1244 = vmatprep.subr.bf16.mxu1 %v1566_v0  ;;  %v1399_v7 = vld [vmem:[#allocation2 + $0x60] sm:$0xff]  }
  0x75   :  { %1220 = vmatprep.subr.bf16.mxu0 %v1566_v0 }
  0x77   :  { %1245 = vmatpush3.bf16.msra.mxu1 %v1392_v37  ;;  %v1403_v37 = vld [vmem:[#allocation4 + $0x40] sm:$0xff]  }
  0x78   :  { %1221 = vmatpush3.bf16.msra.mxu0 %v1376_v8  ;;  %1246 = vmatprep.subr.bf16.mxu1 %v1566_v0  ;;  %v1400_v8 = vld [vmem:[#allocation2 + $0x68] sm:$0xff]  }
  0x79   :  { %1226 = vmatprep.subr.bf16.mxu0 %v1566_v0 }
  0x7b   :  { %1223 = vmatmul.mubr.bf16.vlgmr.msra.gmra.mrb[0].mxu0 %v1726_v9  ;;  %1247 = vmatpush3.bf16.msra.mxu1 %v1394_v39  ;;  %v1405_v39 = vld [vmem:[#allocation4 + $0x50] sm:$0xff]  }
  0x7c   :  { %1228 = vmatprep.mubr.msk.bf16.mxu0 %vm1567_vm0, %v1566_v0  ;;  %1272 = vmatprep.subr.bf16.mxu1 %v1566_v0 }
  0xdd   :  { %v1770_v40 = vpop.permute.xlu0 %281 }
  0xe1   :  { %v1772_v43 = vpop.permute.xlu0 %286 }
 0x14e   :  { %v219_v20 = vpop.f32.mrb[0].mxu0 }
 0x14f   :  { %v220_v21 = vadd.f32 %v1072_v19, %v219_v20  ;;  %v1224_v22 = vpop.f32.mrb[1].mxu0  ;;  %v1411_v20 = vld [vmem:[#allocation6 + $0x40] sm:$0xff]  }
 0x150   :  { %v222_v23 = vpop.f32.mrb[2].mxu0  ;;  %v1413_v22 = vld [vmem:[#allocation6 + $0x50] sm:$0xff]  }
 0x151   :  { %v223_v24 = vadd.f32 %v1072_v19, %v222_v23  ;;  %v1225_v25 = vpop.f32.mrb[3].mxu0  ;;  %v226_v26 = vmax.f32 %v220_v21, 0.0  ;;  %v1412_v21 = vld [vmem:[#allocation6 + $0x48] sm:$0xff]   ;;  %v1414_v23 = vld [vmem:[#allocation6 + $0x58] sm:$0xff]  }
 0x152   :  { %v1416_v25 = vld [vmem:[#allocation6 + $0x68] sm:$0xff]  }
 0x153   :  { %v227_v27 = vmax.f32 %v223_v24, 0.0  ;;  %v1415_v24 = vld [vmem:[#allocation6 + $0x60] sm:$0xff]  }
 0x155   :  { %v228_v28 = vpack.c.bf16 %v227_v27, %v226_v26  ;;  %v1102_v26 = vld [vmem:[%s1838_s4 + $0x1] ss:$0 sm:$0xff] }
 0x157   :  { %1227 = vmatpush3.bf16.msra.mxu0 %v228_v28 }
 0x158   :  { %1252 = vmatprep.subr.bf16.mxu0 %v1566_v0 }
 0x15a   :  { %1229 = vmatmul.mubr.msk.bf16.vlgmr.msra.gmra.mrb[4].mxu0 %vm234_vm1, %v1750_v29 }
 0x15b   :  { %1253 = vmatpush3.bf16.msra.mxu0 %v1379_v30  ;;  %1268 = vmatprep.mubr.msk.bf16.mxu0 %vm1567_vm0, %v1566_v0 }
 0x15c   :  { %1254 = vmatprep.subr.bf16.mxu0 %v1566_v0 }
 0x15f   :  { %1255 = vmatpush3.bf16.msra.mxu0 %v1381_v31 }
 0x160   :  { %1256 = vmatprep.subr.bf16.mxu0 %v1566_v0 }
 0x163   :  { %1257 = vmatpush3.bf16.msra.mxu0 %v1383_v32 }
 0x164   :  { %1258 = vmatprep.subr.bf16.mxu0 %v1566_v0 }
 0x167   :  { %1259 = vmatpush3.bf16.msra.mxu0 %v1385_v33 }
 0x168   :  { %1260 = vmatprep.subr.bf16.mxu0 %v1566_v0 }
 0x16b   :  { %1261 = vmatpush3.bf16.msra.mxu0 %v1387_v34 }
 0x16c   :  { %1262 = vmatprep.subr.bf16.mxu0 %v1566_v0 }
 0x16f   :  { %1263 = vmatpush3.bf16.msra.mxu0 %v1389_v35 }
 0x170   :  { %1264 = vmatprep.subr.bf16.mxu0 %v1566_v0 }
 0x173   :  { %1265 = vmatpush3.bf16.msra.mxu0 %v1391_v36 }
 0x174   :  { %1266 = vmatprep.subr.bf16.mxu0 %v1566_v0 }
 0x177   :  { %1267 = vmatpush3.bf16.msra.mxu0 %v1393_v38  ;;  %v1404_v38 = vld [vmem:[#allocation4 + $0x48] sm:$0xff]  }
 0x178   :  { %1292 = vmatprep.subr.bf16.mxu0 %v1566_v0 }
 0x17a   :  { %1269 = vmatmul.mubr.bf16.vlgmr.msra.gmra.mrb[8].mxu0 %v1726_v9  ;;  %v1401_v9 = vld [vmem:[#allocation2 + $0x70] sm:$0xff]  }
 0x17b   :  { %1294 = vmatprep.mubr.msk.bf16.mxu0 %vm1567_vm0, %v1566_v0 }
 0x22d   :  { %v272_v41 = vpop.f32.mrb[4].mxu0 }
 0x22e   :  { %v1230_v42 = vpop.f32.mrb[5].mxu0  ;;  %v289_v45 = vmul.f32 %v1770_v40, %v272_v41  ;;  %v1406_v41 = vld [vmem:[#allocation4 + $0x58] sm:$0xff]  }
 0x22f   :  { %v275_v44 = vpop.f32.mrb[6].mxu0  ;;  %v1407_v42 = vld [vmem:[#allocation4 + $0x60] sm:$0xff]  }
 0x230   :  { %v290_v46 = vmul.f32 %v1772_v43, %v275_v44  ;;  %v1231_v47 = vpop.f32.mrb[7].mxu0  ;;  %v1409_v44 = vld [vmem:[#allocation4 + $0x70] sm:$0xff]  }
 0x231   :  { %v1418_v47 = vld [vmem:[#allocation6 + $0x78] sm:$0xff]  }
 0x232   :  { %v307_v48 = vpack.c.bf16 %v290_v46, %v289_v45  ;;  %v1410_v45 = vld [vmem:[#allocation4 + $0x78] sm:$0xff]   ;;  %v1417_v46 = vld [vmem:[#allocation6 + $0x70] sm:$0xff]  }
 0x234   :  { %1249 = vmatmul.mubr.bf16.vlgmr.msra.gmra.mrb[0].mxu1 %v307_v48 }
 0x235   :  { %1288 = vmatprep.mubr.msk.bf16.mxu1 %vm1567_vm0, %v1566_v0  ;;  %1273 = vmatpush3.bf16.msra.mxu1 %v1395_v53 }
 0x236   :  { %1274 = vmatprep.subr.bf16.mxu1 %v1566_v0 }
 0x239   :  { %1275 = vmatpush3.bf16.msra.mxu1 %v1396_v54 }
 0x23a   :  { %1276 = vmatprep.subr.bf16.mxu1 %v1566_v0 }
 0x23d   :  { %1277 = vmatpush3.bf16.msra.mxu1 %v1397_v55 }
 0x23e   :  { %1278 = vmatprep.subr.bf16.mxu1 %v1566_v0 }
 0x241   :  { %1279 = vmatpush3.bf16.msra.mxu1 %v1398_v6 }
 0x242   :  { %1280 = vmatprep.subr.bf16.mxu1 %v1566_v0 }
 0x245   :  { %1281 = vmatpush3.bf16.msra.mxu1 %v1399_v7 }
 0x246   :  { %1282 = vmatprep.subr.bf16.mxu1 %v1566_v0 }
 0x249   :  { %1283 = vmatpush3.bf16.msra.mxu1 %v1400_v8 }
 0x24a   :  { %1284 = vmatprep.subr.bf16.mxu1 %v1566_v0 }
 0x24d   :  { %v495_v49 = vpop.f32.mrb[8].mxu0  ;;  %1285 = vmatpush3.bf16.msra.mxu1 %v1401_v9 }
 0x24e   :  { %v1270_v50 = vpop.f32.mrb[9].mxu0  ;;  %1286 = vmatprep.subr.bf16.mxu1 %v1566_v0 }
 0x24f   :  { %v498_v51 = vpop.f32.mrb[10].mxu0 }
 0x250   :  { %v1271_v52 = vpop.f32.mrb[11].mxu0 }
 0x251   :  { %1287 = vmatpush3.bf16.msra.mxu1 %v1402_v10  ;;  %v1422_v10 = vld [vmem:[#allocation7 + $0x18] sm:$0xff]  }
 0x252   :  { %1298 = vmatprep.subr.bf16.mxu1 %v1566_v0 }
 0x307   :  { %v406_v56 = vpop.f32.mrb[0].mxu1 }
 0x308   :  { %v496_v58 = vadd.f32 %v495_v49, %v406_v56  ;;  %v1250_v59 = vpop.f32.mrb[1].mxu1 }
 0x309   :  { %v409_v60 = vpop.f32.mrb[2].mxu1  ;;  %v1419_v59 = vld [vmem:[#allocation7] sm:$0xff]  }
 0x30a   :  { %v499_v61 = vadd.f32 %v498_v51, %v409_v60  ;;  %v1251_v62 = vpop.f32.mrb[3].mxu1  ;;  %v509_v63 = vadd.f32 %v1100_v57, %v496_v58  ;;  %v1420_v60 = vld [vmem:[#allocation7 + $0x8] sm:$0xff]  }
 0x30c   :  { %v510_v1 = vadd.f32 %v1100_v57, %v499_v61  ;;  %v511_v2 = vmax.f32 %v509_v63, 0.0  ;;  %v1421_v61 = vld [vmem:[#allocation7 + $0x10] sm:$0xff]  }
 0x30e   :  { %v512_v3 = vmax.f32 %v510_v1, 0.0  ;;  %v513_v4 = vmul.f32 %v511_v2, %v511_v2 }
 0x310   :  { %515 = vadd.xlane.f32.xlu1 %v513_v4  ;;  %v514_v5 = vmul.f32 %v512_v3, %v512_v3 }
 0x314   :  { %517 = vadd.xlane.f32.xlu1 %v514_v5 }
 0x39d   :  { %v516_v11 = vpop.xlane.xlu1 %515 }
 0x39e   :  { %v519_v12 = vmax.f32 %v516_v11, 1e-24  ;;  %v1423_v11 = vld [vmem:[#allocation7 + $0x20] sm:$0xff]  }
 0x3a0   :  { %1427 = vrsqrt.f32 %v519_v12  ;;  %v1424_v12 = vld [vmem:[#allocation7 + $0x28] sm:$0xff]  }
 0x3a1   :  { %v518_v13 = vpop.xlane.xlu1 %517 }
 0x3a2   :  { %v520_v14 = vmax.f32 %v518_v13, 1e-24  ;;  %v1425_v13 = vld [vmem:[#allocation7 + $0x30] sm:$0xff]  }
 0x3a4   :  { %1429 = vrsqrt.f32 %v520_v14  ;;  %v1426_v14 = vld [vmem:[#allocation7 + $0x38] sm:$0xff]  }
 0x3aa   :  { %v1428_v15 = vpop.eup %1427 }
 0x3ab   :  { %v523_v17 = vmul.f32 %v1428_v15, %v511_v2 }
 0x3ae   :  { %v1430_v16 = vpop.eup %1429 }
 0x3af   :  { %v524_v18 = vmul.f32 %v1430_v16, %v512_v3 }
 0x3b1   :  { %v525_v19 = vpack.c.bf16 %v524_v18, %v523_v17 }
 0x3b3   :  { %1289 = vmatmul.mubr.bf16.vlgmr.msra.gmra.mrb[4].mxu1 %v525_v19 }
 0x3b4   :  { %1314 = vmatprep.mubr.msk.bf16.mxu1 %vm1567_vm0, %v1566_v0  ;;  %1299 = vmatpush3.bf16.msra.mxu1 %v1411_v20 }
 0x3b5   :  { %1300 = vmatprep.subr.bf16.mxu1 %v1566_v0 }
 0x3b8   :  { %1301 = vmatpush3.bf16.msra.mxu1 %v1412_v21 }
 0x3b9   :  { %1302 = vmatprep.subr.bf16.mxu1 %v1566_v0 }
 0x3bc   :  { %1303 = vmatpush3.bf16.msra.mxu1 %v1413_v22 }
 0x3bd   :  { %1304 = vmatprep.subr.bf16.mxu1 %v1566_v0 }
 0x3c0   :  { %1305 = vmatpush3.bf16.msra.mxu1 %v1414_v23 }
 0x3c1   :  { %1306 = vmatprep.subr.bf16.mxu1 %v1566_v0 }
 0x3c4   :  { %1307 = vmatpush3.bf16.msra.mxu1 %v1415_v24  ;;  %v1036_v24 = vlaneseq }
 0x3c5   :  { %1308 = vmatprep.subr.bf16.mxu1 %v1566_v0 }
 0x3c8   :  { %1309 = vmatpush3.bf16.msra.mxu1 %v1416_v25  ;;  %v1037_v25 = vand.u32 127, %v1036_v24 }
 0x3c9   :  { %1310 = vmatprep.subr.bf16.mxu1 %v1566_v0 }
 0x3ca   :  { %vm1038_vm2 = vcmp.lt.s32.totalorder %v1037_v25, 4 }
 0x3cc   :  { %1311 = vmatpush3.bf16.msra.mxu1 %v1417_v46 }
 0x3cd   :  { %1312 = vmatprep.subr.bf16.mxu1 %v1566_v0 }
 0x3d0   :  { %1313 = vmatpush3.bf16.msra.mxu1 %v1418_v47 }
 0x3d1   :  { %1338 = vmatprep.subr.bf16.mxu1 %v1566_v0 }
 0x486   :  { %v633_v27 = vpop.f32.mrb[4].mxu1 }
 0x487   :  { %v634_v28 = vadd.f32 %v1102_v26, %v633_v27  ;;  %v1290_v30 = vpop.f32.mrb[5].mxu1 }
 0x488   :  { %v636_v31 = vpop.f32.mrb[6].mxu1 }
 0x489   :  { %v637_v32 = vadd.f32 %v1102_v26, %v636_v31  ;;  %v1291_v33 = vpop.f32.mrb[7].mxu1  ;;  %v640_v34 = vmax.f32 %v634_v28, 0.0  ;;  %v1130_v26 = vld [vmem:[#allocation9] ss:$0 sm:$0xff] }
 0x48b   :  { %v641_v35 = vmax.f32 %v637_v32, 0.0 }
 0x48d   :  { %v642_v36 = vpack.c.bf16 %v641_v35, %v640_v34 }
 0x48f   :  { %1293 = vmatpush3.bf16.msra.mxu0 %v642_v36 }
 0x490   :  { %1318 = vmatprep.subr.bf16.mxu0 %v1566_v0 }
 0x492   :  { %1295 = vmatmul.mubr.msk.bf16.vlgmr.msra.gmra.mrb[12].mxu0 %vm234_vm1, %v1750_v29  ;;  %v1408_v29 = vld [vmem:[#allocation4 + $0x68] sm:$0xff]  }
 0x493   :  { %1319 = vmatpush3.bf16.msra.mxu0 %v1403_v37  ;;  %1334 = vmatprep.mubr.msk.bf16.mxu0 %vm1567_vm0, %v1566_v0 }
 0x494   :  { %1320 = vmatprep.subr.bf16.mxu0 %v1566_v0 }
 0x497   :  { %1321 = vmatpush3.bf16.msra.mxu0 %v1404_v38 }
 0x498   :  { %1322 = vmatprep.subr.bf16.mxu0 %v1566_v0 }
 0x49b   :  { %1323 = vmatpush3.bf16.msra.mxu0 %v1405_v39 }
 0x49c   :  { %1324 = vmatprep.subr.bf16.mxu0 %v1566_v0 }
 0x49f   :  { %1325 = vmatpush3.bf16.msra.mxu0 %v1406_v41 }
 0x4a0   :  { %1326 = vmatprep.subr.bf16.mxu0 %v1566_v0 }
 0x4a3   :  { %1327 = vmatpush3.bf16.msra.mxu0 %v1407_v42 }
 0x4a4   :  { %1328 = vmatprep.subr.bf16.mxu0 %v1566_v0 }
 0x4a7   :  { %1329 = vmatpush3.bf16.msra.mxu0 %v1408_v29 }
 0x4a8   :  { %1330 = vmatprep.subr.bf16.mxu0 %v1566_v0 }
 0x4ab   :  { %1331 = vmatpush3.bf16.msra.mxu0 %v1409_v44 }
 0x4ac   :  { %1332 = vmatprep.subr.bf16.mxu0 %v1566_v0 }
 0x4af   :  { %1333 = vmatpush3.bf16.msra.mxu0 %v1410_v45 }
 0x4b2   :  { %1335 = vmatmul.mubr.bf16.vlgmr.msra.gmra.mrb[16].mxu0 %v525_v19 }
 0x565   :  { %v677_v48 = vpop.f32.mrb[12].mxu0 }
 0x566   :  { %v1296_v49 = vpop.f32.mrb[13].mxu0  ;;  %v684_v51 = vmul.f32 %v677_v48, %v1770_v40 }
 0x567   :  { %v680_v50 = vpop.f32.mrb[14].mxu0 }
 0x568   :  { %v685_v52 = vmul.f32 %v680_v50, %v1772_v43  ;;  %v1297_v53 = vpop.f32.mrb[15].mxu0  ;;  %v1129_v43 = vld [vmem:[%s1841_s7 + $0x1] ss:$0 sm:$0xff] }
 0x56a   :  { %v703_v54 = vpack.c.bf16 %v685_v52, %v684_v51 }
 0x56c   :  { %1315 = vmatmul.mubr.bf16.vlgmr.msra.gmra.mrb[8].mxu1 %v703_v54 }
 0x56d   :  { %1354 = vmatprep.mubr.msk.bf16.mxu1 %vm1567_vm0, %v1566_v0  ;;  %1339 = vmatpush3.bf16.msra.mxu1 %v1419_v59 }
 0x56e   :  { %1340 = vmatprep.subr.bf16.mxu1 %v1566_v0 }
 0x571   :  { %1341 = vmatpush3.bf16.msra.mxu1 %v1420_v60 }
 0x572   :  { %1342 = vmatprep.subr.bf16.mxu1 %v1566_v0 }
 0x575   :  { %1343 = vmatpush3.bf16.msra.mxu1 %v1421_v61 }
 0x576   :  { %1344 = vmatprep.subr.bf16.mxu1 %v1566_v0 }
 0x579   :  { %1345 = vmatpush3.bf16.msra.mxu1 %v1422_v10 }
 0x57a   :  { %1346 = vmatprep.subr.bf16.mxu1 %v1566_v0 }
 0x57d   :  { %1347 = vmatpush3.bf16.msra.mxu1 %v1423_v11 }
 0x57e   :  { %1348 = vmatprep.subr.bf16.mxu1 %v1566_v0 }
 0x581   :  { %1349 = vmatpush3.bf16.msra.mxu1 %v1424_v12 }
 0x582   :  { %1350 = vmatprep.subr.bf16.mxu1 %v1566_v0 }
 0x585   :  { %v892_v55 = vpop.f32.mrb[16].mxu0  ;;  %1351 = vmatpush3.bf16.msra.mxu1 %v1425_v13 }
 0x586   :  { %v1336_v56 = vpop.f32.mrb[17].mxu0  ;;  %1352 = vmatprep.subr.bf16.mxu1 %v1566_v0 }
 0x587   :  { %v895_v57 = vpop.f32.mrb[18].mxu0 }
 0x588   :  { %v1337_v58 = vpop.f32.mrb[19].mxu0 }
 0x589   :  { %1353 = vmatpush3.bf16.msra.mxu1 %v1426_v14 }
 0x63f   :  { %v803_v40 = vpop.f32.mrb[8].mxu1 }
 0x640   :  { %v893_v62 = vadd.f32 %v892_v55, %v803_v40  ;;  %v1316_v63 = vpop.f32.mrb[9].mxu1 }
 0x641   :  { %v806_v1 = vpop.f32.mrb[10].mxu1 }
 0x642   :  { %v907_v2 = vadd.f32 %v1129_v43, %v893_v62  ;;  %v896_v3 = vadd.f32 %v895_v57, %v806_v1  ;;  %v1317_v4 = vpop.f32.mrb[11].mxu1 }
 0x644   :  { %v909_v5 = vmax.f32 %v907_v2, 0.0  ;;  %v908_v6 = vadd.f32 %v1129_v43, %v896_v3 }
 0x646   :  { %v910_v7 = vmax.f32 %v908_v6, 0.0  ;;  %v911_v8 = vmul.f32 %v909_v5, %v909_v5 }
 0x648   :  { %913 = vadd.xlane.f32.xlu0 %v911_v8  ;;  %v912_v9 = vmul.f32 %v910_v7, %v910_v7 }
 0x64a   :  { %915 = vadd.xlane.f32.xlu1 %v912_v9 }
 0x6d5   :  { %v914_v15 = vpop.xlane.xlu0 %913 }
 0x6d6   :  { %v917_v16 = vmax.f32 %v914_v15, 1e-24 }
 0x6d7   :  { %v916_v17 = vpop.xlane.xlu1 %915 }
 0x6d8   :  { %1431 = vrsqrt.f32 %v917_v16  ;;  %v918_v18 = vmax.f32 %v916_v17, 1e-24 }
 0x6da   :  { %1433 = vrsqrt.f32 %v918_v18 }
 0x6e2   :  { %v1432_v19 = vpop.eup %1431 }
 0x6e3   :  { %v921_v21 = vmul.f32 %v1432_v19, %v909_v5 }
 0x6e4   :  { %v1434_v20 = vpop.eup %1433 }
 0x6e5   :  { %v922_v22 = vmul.f32 %v1434_v20, %v910_v7 }
 0x6e7   :  { %v923_v23 = vpack.c.bf16 %v922_v22, %v921_v21 }
 0x6e9   :  { %1355 = vmatmul.mubr.bf16.vlgmr.msra.gmra.mrb[12].mxu1 %v923_v23 }
 0x7bc   :  { %v1029_v27 = vpop.f32.mrb[12].mxu1 }
 0x7bd   :  { %v1030_v28 = vadd.f32 %v1130_v26, %v1029_v27  ;;  %v1356_v0 = vpop.f32.mrb[13].mxu1 }
 0x7be   :  { %v1032_v30 = vpop.f32.mrb[14].mxu1 }
 0x7bf   :  { %v1033_v31 = vadd.f32 %v1130_v26, %v1032_v30  ;;  %v1357_v32 = vpop.f32.mrb[15].mxu1  ;;  %v1039_v33 = vsel %vm1038_vm2, %v1030_v28, -1e+30 }
 0x7c0   :  { %1041 = vmax.xlane.f32.xlu1 %v1039_v33 }
 0x7c1   :  { %v1040_v34 = vsel %vm1038_vm2, %v1033_v31, -1e+30 }
 0x7c4   :  { %1043 = vmax.xlane.f32.xlu1 %v1040_v34 }
 0x84d   :  { %v1042_v35 = vpop.xlane.xlu1 %1041 }
 0x84e   :  { %v1045_v36 = vsub.f32 %v1039_v33, %v1042_v35 }
 0x850   :  { %v1047_v37 = vmul.f32 1.442695, %v1045_v36 }
 0x851   :  { %v1044_v38 = vpop.xlane.xlu1 %1043 }
 0x852   :  { %1435 = vpow2.f32 %v1047_v37  ;;  %v1046_v39 = vsub.f32 %v1040_v34, %v1044_v38 }
 0x854   :  { %v1049_v41 = vmul.f32 1.442695, %v1046_v39 }
 0x856   :  { %1437 = vpow2.f32 %v1049_v41 }
 0x85c   :  { %v1436_v42 = vpop.eup %1435 }
 0x85d   :  { %1051 = vadd.xlane.f32.xlu1 %v1436_v42 }
 0x860   :  { %v1438_v29 = vpop.eup %1437 }
 0x861   :  { %1053 = vadd.xlane.f32.xlu1 %v1438_v29 }
 0x8ea   :  { %v1052_v44 = vpop.xlane.xlu1 %1051 }
 0x8eb   :  { %1439 = vlog2.f32 %v1052_v44 }
 0x8ee   :  { %v1054_v45 = vpop.xlane.xlu1 %1053 }
 0x8ef   :  { %1441 = vlog2.f32 %v1054_v45 }
 0x8f5   :  { %v1440_v46 = vpop.eup %1439 }
 0x8f6   :  { %v1056_v47 = vmul.f32 0.6931472, %v1440_v46 }
 0x8f8   :  { %v1059_v48 = vadd.f32 %v1056_v47, %v1042_v35 }
 0x8f9   :  { %v1442_v49 = vpop.eup %1441 }
 0x8fa   :  { %v1061_v50 = vsub.f32 %v1039_v33, %v1059_v48  ;;  %v1058_v51 = vmul.f32 0.6931472, %v1442_v49 }
 0x8fc   :  { %1063 = vst [vmem:[%s1844_s10] sm:$0xff] %v1061_v50  ;;  %v1060_v52 = vadd.f32 %v1058_v51, %v1044_v38 }
 0x8fe   :  { %v1062_v53 = vsub.f32 %v1040_v34, %v1060_v52 }
 0x900   :  { %1064 = vst [vmem:[%s1844_s10 + $0x8] sm:$0xff] %v1062_v53 }
 0x901   :  { %1069 = vsyncpa [#allocation3], 1 }
 0x902   :  { %1070 = vsyncpa [#allocation5], 1 }
 0x903   :  { %1071 = vsyncpa [#allocation8], 1 }

</bundles_post_ra>
